<compile_context>
chip_gen: v6e
topology: v6e:2x2x1
jax: 0.10.0
libtpu: 0.0.40
codegen_flags: <defaults>
</compile_context>

<pallas_src>
import functools

import jax
import jax.numpy as jnp
from jax.experimental import pallas as pl
from jax.experimental.pallas import tpu as pltpu


def _rmsnorm_kernel(x_ref, w_ref, o_ref, *, eps: float, cast_to_x_dtype: bool):
    # x_ref: (row_tile, dim), w_ref: (1, dim) already f32, o_ref: (row_tile, dim)
    x = x_ref[...].astype(jnp.float32)                      # x.float()
    ms = jnp.mean(x * x, axis=-1, keepdims=True)            # mean(x*x, dim=-1)
    inv = jax.lax.rsqrt(ms + eps)                           # rsqrt(. + eps)
    normed = x * inv
    if cast_to_x_dtype:
        # Matches PyTorch `.type_as(x)` bit-exactly for sub-f32 activations;
        # skipped (no-op) for f32 inputs.
        normed = normed.astype(x_ref.dtype).astype(jnp.float32)
    o_ref[...] = (normed * w_ref[...]).astype(o_ref.dtype)  # * weight


def _sublane_multiple(dtype) -> int:
    itemsize = jnp.dtype(dtype).itemsize
    return max(8, 32 // itemsize)        # 8 for f32, 16 for bf16, 32 for int8


def _vmem_params():
    """Derive (block budget, scoped vmem limit, #TensorCores) from hardware."""
    phys = 128 * 1024 * 1024
    cores = None
    try:
        info = pltpu.get_tpu_info()
        phys = int(getattr(info, "vmem_capacity_bytes", phys) or phys)
        cores = getattr(info, "num_cores", None)
    except Exception:
        pass
    if phys <= 64 * 1024 * 1024:
        # v7x-class: 64 MiB physical VMEM per TC, 2 TCs per chip.
        budget = 16 * 1024 * 1024
        limit = 40 * 1024 * 1024
        num_cores = int(cores) if cores else 2
    else:
        # v5e / v6e: 128 MiB physical VMEM, single TC.
        budget = 28 * 1024 * 1024
        limit = 64 * 1024 * 1024
        num_cores = int(cores) if cores else 1
    return budget, limit, num_cores


def _choose_row_tile(rows: int, dim: int, x_bytes: int, out_bytes: int,
                     sublane_mult: int, vmem_budget_bytes: int,
                     num_cores: int) -> int:
    """Largest sublane-aligned row tile such that the double-buffered in/out
    blocks PLUS the in-kernel f32 working copies fit the VMEM budget, with a
    bytes-based (~8 MiB input block) cap instead of a fixed row cap.  On
    multi-TensorCore parts, also aim for >= 4 pipelined steps per core and an
    even split of steps across cores."""
    # Per-row VMEM cost: 2x (double-buffered) input + output blocks, plus the
    # f32 upcast and the f32 product temp (single-buffered, ~8 B per element).
    per_row = dim * (2 * (x_bytes + out_bytes) + 8)
    by_vmem = vmem_budget_bytes // per_row
    # Bytes-based cap: ~8 MiB input block keeps the ~0.35 us/step overhead
    # negligible against DMA time on all generations.
    by_block = (8 * 1024 * 1024) // (dim * x_bytes)
    tile = max(1, min(by_vmem, by_block, rows))

    if num_cores > 1:
        # Want >= 4 steps per core so each core keeps its double buffer busy.
        min_steps = 4 * num_cores
        tile = min(tile, max(sublane_mult, pl.cdiv(rows, min_steps)))

    tile = max(sublane_mult, (tile // sublane_mult) * sublane_mult)

    if num_cores > 1:
        # Best effort: make the step count a multiple of the core count so no
        # core idles on the tail.
        steps = pl.cdiv(rows, tile)
        if steps > 1 and steps % num_cores:
            steps_up = ((steps + num_cores - 1) // num_cores) * num_cores
            cand = pl.cdiv(rows, steps_up)
            cand = max(sublane_mult,
                       ((cand + sublane_mult - 1) // sublane_mult) * sublane_mult)
            if pl.cdiv(rows, cand) % num_cores == 0:
                tile = cand
    return int(tile)


def rmsnorm(x: jax.Array, weight: jax.Array, eps: float = 1e-5,
            row_tile: int | None = None) -> jax.Array:
    """RMSNorm over the last axis of x. weight has shape (dim,)."""
    orig_shape = x.shape
    dim = orig_shape[-1]
    assert weight.shape == (dim,)

    # Flatten leading dims into rows; `dim` stays on the lane axis.
    rows = 1
    for s in orig_shape[:-1]:
        rows *= s
    x2d = x.reshape(rows, dim)
    # Pre-cast weight to f32 once in the wrapper (removes a per-step cast).
    w2d = weight.astype(jnp.float32).reshape(1, dim)

    # Output dtype follows PyTorch promotion of (x.dtype, weight.dtype).
    out_dtype = jnp.promote_types(x.dtype, weight.dtype)

    x_bytes = jnp.dtype(x.dtype).itemsize
    out_bytes = jnp.dtype(out_dtype).itemsize
    sublane_mult = _sublane_multiple(x.dtype)

    vmem_budget, vmem_limit, num_cores = _vmem_params()
    if row_tile is None:
        row_tile = _choose_row_tile(rows, dim, x_bytes, out_bytes,
                                    sublane_mult, vmem_budget, num_cores)

    grid = (pl.cdiv(rows, row_tile),)   # ragged tail handled by block padding

    kernel = functools.partial(
        _rmsnorm_kernel, eps=eps,
        cast_to_x_dtype=(jnp.dtype(x.dtype) != jnp.float32))

    out2d = pl.pallas_call(
        kernel,
        out_shape=jax.ShapeDtypeStruct((rows, dim), out_dtype),
        grid_spec=pltpu.PrefetchScalarGridSpec(
            num_scalar_prefetch=0,
            grid=grid,
            in_specs=[
                pl.BlockSpec((row_tile, dim), lambda i: (i, 0)),
                pl.BlockSpec((1, dim), lambda i: (0, 0)),
            ],
            out_specs=pl.BlockSpec((row_tile, dim), lambda i: (i, 0)),
        ),
        compiler_params=pltpu.CompilerParams(
            # TODO(synk): verify via Mosaic MLIR/xprof that this axis is
            # core-sharded on 2-TC parts; if not, switch to an explicit core
            # axis with pl.core_map + pltpu.create_tensorcore_mesh.
            dimension_semantics=("parallel",),
            vmem_limit_bytes=vmem_limit),
    )(x2d, w2d)

    return out2d.reshape(orig_shape)


def rmsnorm_ref(x, weight, eps=1e-5):
    xf = x.astype(jnp.float32)
    inv = jax.lax.rsqrt(jnp.mean(xf * xf, axis=-1, keepdims=True) + eps)
    normed = (xf * inv).astype(x.dtype)
    return normed * weight


if __name__ == "__main__":
    key = jax.random.PRNGKey(0)

    # Shapes implied by the module's forward: (batch, seq, hidden).
    batch, seq, hidden = 2, 8, 32
    x = jax.random.normal(key, (batch, seq, hidden), dtype=jnp.float32)
    # Deterministic parameter init, matching nn.Parameter(torch.ones(dim)).
    weight = jnp.ones((hidden,), dtype=jnp.float32)

    out = jax.block_until_ready(rmsnorm(x, weight, eps=1e-5))
    ref = rmsnorm_ref(x, weight, eps=1e-5)
    assert out.shape == x.shape
    assert out.dtype == ref.dtype
    assert jnp.allclose(out, ref, atol=1e-5, rtol=1e-5)

    # Extra check: ragged row count (3*5=15 rows), lane-dense dim, bf16 input.
    x2 = jax.random.normal(jax.random.PRNGKey(1), (3, 5, 128),
                           dtype=jnp.bfloat16)
    w2 = (1.0 + 0.1 * jax.random.normal(jax.random.PRNGKey(2), (128,),
                                        dtype=jnp.float32))
    out2 = jax.block_until_ready(rmsnorm(x2, w2, eps=1e-5))
    ref2 = rmsnorm_ref(x2, w2, eps=1e-5)
    assert out2.shape == x2.shape
    assert out2.dtype == ref2.dtype
    assert jnp.allclose(out2.astype(jnp.float32), ref2.astype(jnp.float32),
                        atol=1e-2, rtol=1e-2)

    print("KERNEL_OK")
</pallas_src>

<mosaic_0001>
module attributes {stable_mosaic.version = 11 : i64} {
  func.func @_rmsnorm_kernel(%arg0: i32, %arg1: memref<16x32xf32, #tpu.memory_space<vmem>>, %arg2: memref<1x32xf32, #tpu.memory_space<vmem>>, %arg3: memref<16x32xf32, #tpu.memory_space<vmem>>) attributes {dimension_semantics = [#tpu.dimension_semantics<parallel>], iteration_bounds = array<i64: 1>, scalar_prefetch = 0 : i64, scratch_operands = 0 : i64, tpu.core_type = #tpu.core_type<tc>, window_params = [{transform_indices = @transform_0, window_bounds = array<i64: 16, 32>}, {pipeline_mode = #tpu.pipeline_mode<synchronous>, transform_indices = @transform_1, window_bounds = array<i64: 1, 32>}, {transform_indices = @transform_2, window_bounds = array<i64: 16, 32>}]} {
    %c0 = arith.constant 0 : index
    %c0_0 = arith.constant 0 : index
    %0 = vector.load %arg1[%c0, %c0_0] : memref<16x32xf32, #tpu.memory_space<vmem>>, vector<16x32xf32>
    %1 = arith.mulf %0, %0 : vector<16x32xf32>
    %cst = arith.constant dense<0.000000e+00> : vector<16xf32>
    %2 = vector.multi_reduction <add>, %1, %cst [1] : vector<16x32xf32> to vector<16xf32>
    %3 = vector.shape_cast %2 : vector<16xf32> to vector<16x1xf32>
    %cst_1 = arith.constant 3.200000e+01 : f32
    %4 = vector.broadcast %cst_1 : f32 to vector<16x1xf32>
    %5 = arith.divf %3, %4 : vector<16x1xf32>
    %cst_2 = arith.constant 9.99999974E-6 : f32
    %6 = vector.broadcast %cst_2 : f32 to vector<16x1xf32>
    %7 = arith.addf %5, %6 : vector<16x1xf32>
    %8 = math.rsqrt %7 : vector<16x1xf32>
    %9 = vector.broadcast %8 : vector<16x1xf32> to vector<16x32xf32>
    %10 = arith.mulf %0, %9 : vector<16x32xf32>
    %c0_3 = arith.constant 0 : index
    %c0_4 = arith.constant 0 : index
    %11 = vector.load %arg2[%c0_3, %c0_4] : memref<1x32xf32, #tpu.memory_space<vmem>>, vector<1x32xf32>
    %12 = vector.broadcast %11 : vector<1x32xf32> to vector<16x32xf32>
    %13 = arith.mulf %10, %12 : vector<16x32xf32>
    %c0_5 = arith.constant 0 : index
    %c0_6 = arith.constant 0 : index
    %14 = vector.load %arg3[%c0_5, %c0_6] : memref<16x32xf32, #tpu.memory_space<vmem>>, vector<16x32xf32>
    tpu.vector_store %arg3[%c0_5, %c0_6], %13 {strides = array<i32>} : memref<16x32xf32, #tpu.memory_space<vmem>>, vector<16x32xf32>,
    return
  }
  func.func @transform_0(%arg0: i32) -> (i32, i32) {
    %c0_i32 = arith.constant 0 : i32
    %c0_i32_0 = arith.constant 0 : i32
    return %arg0, %c0_i32 : i32, i32
  }
  func.func @transform_1(%arg0: i32) -> (i32, i32) {
    %c0_i32 = arith.constant 0 : i32
    %c0_i32_0 = arith.constant 0 : i32
    %c0_i32_1 = arith.constant 0 : i32
    return %c0_i32, %c0_i32_0 : i32, i32
  }
  func.func @transform_2(%arg0: i32) -> (i32, i32) {
    %c0_i32 = arith.constant 0 : i32
    %c0_i32_0 = arith.constant 0 : i32
    return %arg0, %c0_i32 : i32, i32
  }
}

</mosaic_0001>

<bundles_post_ra>
// kernel: tpu_custom_call.1
= control target key start
LH: loop header
LB: loop body
LE: loop exit
PB: predicated region body
PF: predicated region fallthrough
CT: control target
= control target key end

     0   :  { %7 = vsyncpa [#allocation3], 0  ;;  %s165_s0 = inlined_call_operand.hbm [shape: f32[16,32], index: 0, kind: input, shape index: {}]   ;;  %s166_s1 = inlined_call_operand.vmem [shape: f32[1,32], index: 1, kind: input, shape index: {}]   ;;  %s167_s2 = inlined_call_operand.hbm [shape: f32[16,32], index: 2, kind: output, shape index: {}]  }
   0x1   :  { %8 = vsyncpa [#allocation4], 0  ;;  %s127_s9 = smov [#allocation2]  }
   0x2   :  { %s14_s10 = sshll.u32 %s127_s9, 4  ;;  %s15_s10 = int_to_ptr.vmem [resolvable:$true] %s14_s10 }
   0x3   :  { %s91_s11 = scalar_lea.vmem %s15_s10, 256  ;;  %p96_p1 = scmp.lt.s32.totalorder %s15_s10, %s15_s10 }
   0x4   :  { %p92_p0 = scmp.ne.s32.totalorder %s15_s10, %s91_s11  ;;  %p97_p2 = scmp.lt.s32.totalorder %s91_s11, %s91_s11 }
   0x6   :  { %p98_p3 = por %p97_p2, %p96_p1 }
   0x8   :  { %p99_p4 = pnand %p98_p3, %p92_p0 }
   0xa   :  { %102 = shalt.err (!%p99_p4)
}
   0xb   :  { %s128_s12 = smov 128   ;;  %s129_s13 = smov 8  }
   0xc   :  { %20 = dma.hbm_to_vmem [thread:$0]  %s165_s0, 256, %s15_s10, [#allocation3], %s128_s12, %s128_s12, %s129_s13  }
   0xd   :  { %123 = dma.done.wait [#allocation3], 256  }
   0xe   :  { %124 = vsyncadd [#allocation3], 4294967040  ;;  %v26_v0 = vld [vmem:[#allocation2] sm:$0xff]  ;;  %vm30_vm0 = vcmask 261120   ;;  %v27_v1 = vld [vmem:[#allocation2 + $0x8] sm:$0xff]  ;;  %s130_s17 = smov [#allocation5]  }
   0xf   :  { %v28_v2 = vmul.f32 %v26_v0, %v26_v0  ;;  %v29_v3 = vmul.f32 %v27_v1, %v27_v1  ;;  %v74_v13 = vld [vmem:[%s166_s1] ss:$0 sm:$0xff]  ;;  %s62_s18 = sshll.u32 %s130_s17, 4  ;;  %s63_s18 = int_to_ptr.vmem [resolvable:$true] %s62_s18 }
  0x10   :  { %s103_s19 = scalar_lea.vmem %s63_s18, 256  ;;  %p108_p6 = scmp.lt.s32.totalorder %s63_s18, %s63_s18 }
  0x11   :  { %v31_v4 = vsel %vm30_vm0, %v28_v2, 0.0  ;;  %v34_v5 = vsel %vm30_vm0, %v29_v3, 0.0  ;;  %p104_p5 = scmp.ne.s32.totalorder %s63_s18, %s103_s19  ;;  %p109_p7 = scmp.lt.s32.totalorder %s103_s19, %s103_s19 }
  0x12   :  { %32 = vadd.xlane.f32.xlu0 %v31_v4 }
  0x13   :  { %p110_p8 = por %p109_p7, %p108_p6 }
  0x15   :  { %p111_p9 = pnand %p110_p8, %p104_p5 }
  0x16   :  { %35 = vadd.xlane.f32.xlu0 %v34_v5 }
  0x9b   :  { %v33_v6 = vpop.xlane.xlu0 %32 }
  0x9c   :  { %v38_v7 = vmul.f32 0.03125, %v33_v6 }
  0x9e   :  { %v40_v8 = vadd.f32 1e-05, %v38_v7 }
  0x9f   :  { %v36_v9 = vpop.xlane.xlu0 %35 }
  0xa0   :  { %79 = vrsqrt.f32 %v40_v8  ;;  %v39_v10 = vmul.f32 0.03125, %v36_v9 }
  0xa2   :  { %v41_v11 = vadd.f32 1e-05, %v39_v10 }
  0xa4   :  { %81 = vrsqrt.f32 %v41_v11 }
  0xad   :  { %v80_v12 = vpop.eup %79 }
  0xae   :  { %v44_v14 = vmul.f32 %v80_v12, %v26_v0 }
  0xb0   :  { %v53_v15 = vmul.f32 %v74_v13, %v44_v14 }
  0xb1   :  { %v82_v16 = vpop.eup %81 }
  0xb2   :  { %v45_v17 = vmul.f32 %v82_v16, %v27_v1  ;;  %55 = vst.msk [vmem:[#allocation5] sm:$0xff] %vm30_vm0, %v53_v15 }
  0xb4   :  { %v54_v18 = vmul.f32 %v74_v13, %v45_v17 }
  0xb6   :  { %56 = vst.msk [vmem:[#allocation5 + $0x8] sm:$0xff] %vm30_vm0, %v54_v18 }
  0xb7   :  { %114 = shalt.err (!%p111_p9)
}
  0xb8   :  { %68 = dma.vmem_to_hbm [thread:$0]  %s63_s18, 256, %s167_s2, [#allocation4], %s128_s12, %s128_s12, %s129_s13  }
  0xb9   :  { %125 = dma.done.wait [#allocation4], 256  }
  0xba   :  { %126 = vsyncadd [#allocation4], 4294967040 }
  0xbb   :  { %72 = vsyncpa [#allocation3], 1 }
  0xbc   :  { %73 = vsyncpa [#allocation4], 1 }

</bundles_post_ra>
